<compile_context>
chip_gen: v5e
topology: v5e:2x2
jax: 0.10.0
libtpu: 0.0.40
codegen_flags: <defaults>
</compile_context>

<pallas_src>
import math

import jax
import jax.numpy as jnp
from jax.experimental import pallas as pl
from jax.experimental.pallas import tpu as pltpu


def crf_kernel(x_ref, w_ref, b_ref, out_ref):
    # x_ref:   (tm, r*H)   row-folded feats block
    # w_ref:   (r*H, r*N)  block-diagonal expanded emission weight (grid-invariant)
    # b_ref:   (1, r*N)    fused (transition + bias) row, tiled r times (grid-invariant)
    # out_ref: (tm, r*N)   lane-dense output block (r*N multiple of 128 when r > 1)
    out_ref[...] = (
        jnp.dot(x_ref[...], w_ref[...], preferred_element_type=jnp.float32)
        + b_ref[...]
    )


def _pick_row_fold(M, H, N, *, max_r=8, max_weight_bytes=2 << 20):
    """Largest r (multiple of the lane-density minimum) such that r | M and the
    block-diagonal weight kron(I_r, W_exp) stays small.  r*N becomes a multiple
    of 128 so output stores are unmasked and the writeback is lane-dense."""
    if N % 128 == 0:
        return 1                      # already lane-dense, no fold needed
    r_min = 128 // math.gcd(N, 128)
    best = 1
    r = r_min
    while r <= max_r:
        if M % r == 0 and 4 * r * r * H * N <= max_weight_bytes:
            best = r
        r += r_min                    # multiples of r_min keep (r*N) % 128 == 0
    return best


def crf_forward(feats, w_e, b_e, transition, *, vmem_budget_bytes=20 << 20):
    """feats: (B, T, H) -> CRF scores (B, T, tagset, tagset), float32.

    out[b, t, i, j] = (feats[b, t] @ w_e.T + b_e)[j] + transition[i, j]
    """
    B, T, H = feats.shape
    tagset = w_e.shape[0]
    M = B * T
    N = tagset * tagset

    # --- fold all grid-invariant math into an expanded weight + bias row ----
    # W_exp[h, i*tagset + j] = w_e[j, h]   (column k -> emission tag j = k % tagset)
    w_exp = jnp.tile(w_e.T.astype(jnp.float32), (1, tagset))            # (H, N)
    # bias_row[i*tagset + j] = transition[i, j] + b_e[j]
    bias_row = (transition.astype(jnp.float32)
                + b_e.astype(jnp.float32)[None, :]).reshape(1, N)       # (1, N)

    # --- fold r consecutive rows into the lane dimension (lane-dense output) -
    r = _pick_row_fold(M, H, N)
    Mr, Kr, Nr = M // r, r * H, r * N
    x = feats.astype(jnp.float32).reshape(Mr, Kr)       # pure reshape, no copy
    if r > 1:
        w_exp = jnp.kron(jnp.eye(r, dtype=jnp.float32), w_exp)          # (Kr, Nr)
        bias_row = jnp.tile(bias_row, (1, r))                           # (1, Nr)

    # --- derive the row tile from a portable VMEM budget ---------------------
    row_bytes = 4 * (Kr + Nr)                       # one input + one output row (f32)
    fixed_bytes = 2 * 4 * Kr * Nr + 2 * 4 * Nr      # weight + bias (double-buffered)
    tm = (vmem_budget_bytes - fixed_bytes) // (2 * row_bytes)   # 2x: double buffers
    tm = max(8, min(int(tm), 8192))
    # Keep >= ~4 grid steps when there is enough work (v7x megacore + pipelining).
    tm = min(tm, max(8, pl.cdiv(pl.cdiv(Mr, 4), 8) * 8))
    tm = (tm // 8) * 8                              # sublane-divisible tile
    grid = pl.cdiv(Mr, tm)                          # ragged tail masked by Pallas

    vmem_limit = int(min(max(2 * tm * row_bytes + fixed_bytes + (4 << 20), 32 << 20),
                         56 << 20))

    out_flat = pl.pallas_call(
        crf_kernel,
        out_shape=jax.ShapeDtypeStruct((Mr, Nr), jnp.float32),
        grid_spec=pltpu.PrefetchScalarGridSpec(
            num_scalar_prefetch=0,
            grid=(grid,),
            in_specs=[
                pl.BlockSpec((tm, Kr), lambda i: (i, 0)),
                pl.BlockSpec((Kr, Nr), lambda i: (0, 0)),
                pl.BlockSpec((1, Nr), lambda i: (0, 0)),
            ],
            out_specs=pl.BlockSpec((tm, Nr), lambda i: (i, 0)),
        ),
        compiler_params=pltpu.CompilerParams(
            dimension_semantics=("parallel",),
            vmem_limit_bytes=vmem_limit,
        ),
    )(x, w_exp, bias_row)

    # (Mr, r*N) row-major is bit-identical to (M, N) row-major: reshape only,
    # no pad, no slice, no extra HBM copy.
    return out_flat.reshape(B, T, tagset, tagset)


if __name__ == "__main__":
    # Small shapes consistent with the module's forward: (batch, timesteps, hidden)
    B, T, H = 2, 8, 32
    tagset = 8

    key = jax.random.PRNGKey(0)
    k_feats, k_w, k_b, k_tr = jax.random.split(key, 4)

    feats = jax.random.normal(k_feats, (B, T, H), dtype=jnp.float32)

    # Deterministic parameter init mimicking nn.Linear default (uniform +/- 1/sqrt(H))
    bound = 1.0 / jnp.sqrt(jnp.float32(H))
    w_e = jax.random.uniform(k_w, (tagset, H), jnp.float32, -bound, bound)
    b_e = jax.random.uniform(k_b, (tagset,), jnp.float32, -bound, bound)
    # The module initializes transition to zeros; use a non-trivial value here
    # to exercise the fused (transition + bias) path as well.
    transition = 0.1 * jax.random.normal(k_tr, (tagset, tagset), dtype=jnp.float32)

    out = crf_forward(feats, w_e, b_e, transition)
    out = jax.block_until_ready(out)

    # Reference check in plain JAX
    emit_ref = feats @ w_e.T + b_e                                   # (B, T, tagset)
    ref = emit_ref[:, :, None, :] + transition[None, None, :, :]     # (B, T, tagset, tagset)
    assert out.shape == (B, T, tagset, tagset)
    assert jnp.allclose(out, ref, atol=1e-5, rtol=1e-5)

    print("KERNEL_OK")
</pallas_src>

<mosaic_0001>
module attributes {stable_mosaic.version = 11 : i64} {
  func.func @crf_kernel(%arg0: i32, %arg1: memref<8x256xf32, #tpu.memory_space<vmem>>, %arg2: memref<256x512xf32, #tpu.memory_space<vmem>>, %arg3: memref<1x512xf32, #tpu.memory_space<vmem>>, %arg4: memref<8x512xf32, #tpu.memory_space<vmem>>) attributes {dimension_semantics = [#tpu.dimension_semantics<parallel>], iteration_bounds = array<i64: 1>, scalar_prefetch = 0 : i64, scratch_operands = 0 : i64, tpu.core_type = #tpu.core_type<tc>, window_params = [{transform_indices = @transform_0, window_bounds = array<i64: 8, 256>}, {pipeline_mode = #tpu.pipeline_mode<synchronous>, transform_indices = @transform_1, window_bounds = array<i64: 256, 512>}, {pipeline_mode = #tpu.pipeline_mode<synchronous>, transform_indices = @transform_2, window_bounds = array<i64: 1, 512>}, {transform_indices = @transform_3, window_bounds = array<i64: 8, 512>}]} {
    %c0 = arith.constant 0 : index
    %c0_0 = arith.constant 0 : index
    %0 = vector.load %arg1[%c0, %c0_0] : memref<8x256xf32, #tpu.memory_space<vmem>>, vector<8x256xf32>
    %c0_1 = arith.constant 0 : index
    %c0_2 = arith.constant 0 : index
    %1 = vector.load %arg2[%c0_1, %c0_2] : memref<256x512xf32, #tpu.memory_space<vmem>>, vector<256x512xf32>
    %cst = arith.constant dense<0.000000e+00> : vector<8x512xf32>
    %2 = tpu.matmul %0, %1, %cst {dimension_numbers = #tpu.dot_dimension_numbers<[1], [0], [0], [1], [0, 0, 1, 1], [], []>} : vector<8x256xf32>, vector<256x512xf32>, vector<8x512xf32> -> vector<8x512xf32>
    %c0_3 = arith.constant 0 : index
    %c0_4 = arith.constant 0 : index
    %3 = vector.load %arg3[%c0_3, %c0_4] : memref<1x512xf32, #tpu.memory_space<vmem>>, vector<1x512xf32>
    %4 = vector.broadcast %3 : vector<1x512xf32> to vector<8x512xf32>
    %5 = arith.addf %2, %4 : vector<8x512xf32>
    %c0_5 = arith.constant 0 : index
    %c0_6 = arith.constant 0 : index
    %6 = vector.load %arg4[%c0_5, %c0_6] : memref<8x512xf32, #tpu.memory_space<vmem>>, vector<8x512xf32>
    tpu.vector_store %arg4[%c0_5, %c0_6], %5 {strides = array<i32>} : memref<8x512xf32, #tpu.memory_space<vmem>>, vector<8x512xf32>,
    return
  }
  func.func @transform_0(%arg0: i32) -> (i32, i32) {
    %c0_i32 = arith.constant 0 : i32
    %c0_i32_0 = arith.constant 0 : i32
    return %arg0, %c0_i32 : i32, i32
  }
  func.func @transform_1(%arg0: i32) -> (i32, i32) {
    %c0_i32 = arith.constant 0 : i32
    %c0_i32_0 = arith.constant 0 : i32
    %c0_i32_1 = arith.constant 0 : i32
    return %c0_i32, %c0_i32_0 : i32, i32
  }
  func.func @transform_2(%arg0: i32) -> (i32, i32) {
    %c0_i32 = arith.constant 0 : i32
    %c0_i32_0 = arith.constant 0 : i32
    %c0_i32_1 = arith.constant 0 : i32
    return %c0_i32, %c0_i32_0 : i32, i32
  }
  func.func @transform_3(%arg0: i32) -> (i32, i32) {
    %c0_i32 = arith.constant 0 : i32
    %c0_i32_0 = arith.constant 0 : i32
    return %arg0, %c0_i32 : i32, i32
  }
}

</mosaic_0001>

<bundles_post_ra>
// kernel: tpu_custom_call.1
= control target key start
LH: loop header
LB: loop body
LE: loop exit
PB: predicated region body
PF: predicated region fallthrough
CT: control target
= control target key end

     0   :  { %8 = vsyncpa [#allocation3], 0  ;;  %s595_s0 = inlined_call_operand.hbm [shape: f32[2,256], index: 0, kind: input, shape index: {}]   ;;  %s596_s1 = inlined_call_operand.hbm [shape: f32[256,512], index: 1, kind: input, shape index: {}]   ;;  %s597_s2 = inlined_call_operand.hbm [shape: f32[1,512], index: 2, kind: input, shape index: {}]   ;;  %s598_s3 = inlined_call_operand.hbm [shape: f32[2,512], index: 3, kind: output, shape index: {}]  }
   0x1   :  { %9 = vsyncpa [#allocation6], 0 }
   0x2   :  { %10 = vsyncpa [#allocation4], 0  ;;  %s28_s14 = sshll.u32 %s596_s1, 4  ;;  %s29_s14 = int_to_ptr.hbm [resolvable:$true] %s28_s14 }
   0x3   :  { %14 = vsyncadd [#allocation3], 192  ;;  %s545_s15 = smov [#allocation5]   ;;  %s15_s19 = sshll.u32 %s595_s0, 4  ;;  %s16_s19 = int_to_ptr.hbm [resolvable:$true] %s15_s19 }
   0x4   :  { %s30_s16 = sshll.u32 %s545_s15, 4  ;;  %s546_s20 = smov 512   ;;  %s31_s16 = int_to_ptr.vmem [resolvable:$true] %s30_s16 }
   0x5   :  { %s547_s21 = smov 32   ;;  %s548_s22 = smov [#allocation2]  }
   0x6   :  { %36 = dma.hbm_to_vmem [thread:$0]  %s29_s14, 16384, %s31_s16, [#allocation6], %s546_s20, %s546_s20, %s547_s21  }
   0x7   :  { %s17_s23 = sshll.u32 %s548_s22, 4  ;;  %s549_s24 = smov 64   ;;  %s18_s23 = int_to_ptr.vmem [resolvable:$true] %s17_s23 }
   0x8   :  { %s550_s25 = smov 4   ;;  %s42_s27 = sshll.u32 %s597_s2, 4  ;;  %s43_s27 = int_to_ptr.hbm [resolvable:$true] %s42_s27 }
   0x9   :  { %23 = dma.hbm_to_vmem [thread:$0]  %s16_s19, 64, %s18_s23, [#allocation3], %s549_s24, %s549_s24, %s550_s25  }
   0xa   :  { %s551_s28 = smov [#allocation7]  }
   0xb   :  { %s44_s29 = sshll.u32 %s551_s28, 4  ;;  %s45_s29 = int_to_ptr.vmem [resolvable:$true] %s44_s29 }
   0xc   :  { %47 = dma.hbm_to_vmem [thread:$0]  %s43_s27, 64, %s45_s29, [#allocation6]  }
   0xd   :  { %539 = dma.done.wait [#allocation3], 256  }
   0xe   :  { %540 = vsyncadd [#allocation3], 4294967040 }
   0xf   :  { %541 = dma.done.wait [#allocation6], 16448  }
  0x10   :  { %542 = vsyncadd [#allocation6], 4294950848  ;;  %v125_v0 = vld [vmem:[#allocation5 + $0x1e8] sm:$0xff]  ;;  %v124_v4 = vld [vmem:[#allocation5 + $0x1e0] sm:$0xff]  ;;  %vm384_vm0 = vcmask 1041408   ;;  %vm386_vm1 = vcmask 1045508  }
  0x11   :  { %v121_v1 = vld [vmem:[#allocation5 + $0x1c8] sm:$0xff]  ;;  %257 = vmatpush.msra.mxu2 %v125_v0  ;;  %217 = vmatpush.msra.mxu0 %v124_v4  ;;  %v120_v7 = vld [vmem:[#allocation5 + $0x1c0] sm:$0xff]  ;;  %v127_v61 = vld [vmem:[#allocation5 + $0x1f8] sm:$0xff]  ;;  %vm390_vm2 = vcmask 1043458   ;;  %vm392_vm3 = vcmask 1045504   ;;  %vm388_vm4 = vcmask 1043456  }
  0x12   :  { %v189_v2 = vld [vmem:[#allocation5 + $0x3e8] sm:$0xff]  ;;  %v188_v9 = vld [vmem:[#allocation5 + $0x3e0] sm:$0xff]  ;;  %v191_v62 = vld [vmem:[#allocation5 + $0x3f8] sm:$0xff]  ;;  %vm394_vm5 = vcmask 1045506  }
  0x13   :  { %277 = vmatpush.msra.mxu3 %v189_v2  ;;  %v185_v3 = vld [vmem:[#allocation5 + $0x3c8] sm:$0xff]  ;;  %258 = vmatpush.msra.mxu2 %v121_v1  ;;  %v116_v11 = vld [vmem:[#allocation5 + $0x1a0] sm:$0xff]  ;;  %v123_v63 = vld [vmem:[#allocation5 + $0x1d8] sm:$0xff] }
  0x14   :  { %v117_v5 = vld [vmem:[#allocation5 + $0x1a8] sm:$0xff]  ;;  %218 = vmatpush.msra.mxu0 %v120_v7  ;;  %237 = vmatpush.msra.mxu1 %v188_v9  ;;  %v184_v12 = vld [vmem:[#allocation5 + $0x3c0] sm:$0xff]  ;;  %v119_v2 = vld [vmem:[#allocation5 + $0x1b8] sm:$0xff] }
  0x15   :  { %v181_v6 = vld [vmem:[#allocation5 + $0x3a8] sm:$0xff]  ;;  %278 = vmatpush.msra.mxu3 %v185_v3  ;;  %259 = vmatpush.msra.mxu2 %v117_v5  ;;  %v112_v13 = vld [vmem:[#allocation5 + $0x180] sm:$0xff]  ;;  %v187_v3 = vld [vmem:[#allocation5 + $0x3d8] sm:$0xff] }
  0x16   :  { %v113_v8 = vld [vmem:[#allocation5 + $0x188] sm:$0xff]  ;;  %v180_v14 = vld [vmem:[#allocation5 + $0x3a0] sm:$0xff]  ;;  %219 = vmatpush.msra.mxu0 %v116_v11  ;;  %238 = vmatpush.msra.mxu1 %v184_v12  ;;  %v126_v4 = vld [vmem:[#allocation5 + $0x1f0] sm:$0xff] }
  0x17   :  { %v177_v10 = vld [vmem:[#allocation5 + $0x388] sm:$0xff]  ;;  %279 = vmatpush.msra.mxu3 %v181_v6  ;;  %260 = vmatpush.msra.mxu2 %v113_v8  ;;  %v108_v17 = vld [vmem:[#allocation5 + $0x160] sm:$0xff]  ;;  %v183_v5 = vld [vmem:[#allocation5 + $0x3b8] sm:$0xff] }
  0x18   :  { %v109_v15 = vld [vmem:[#allocation5 + $0x168] sm:$0xff]  ;;  %v176_v18 = vld [vmem:[#allocation5 + $0x380] sm:$0xff]  ;;  %220 = vmatpush.msra.mxu0 %v112_v13  ;;  %239 = vmatpush.msra.mxu1 %v180_v14  ;;  %v122_v7 = vld [vmem:[#allocation5 + $0x1d0] sm:$0xff] }
  0x19   :  { %v173_v16 = vld [vmem:[#allocation5 + $0x368] sm:$0xff]  ;;  %280 = vmatpush.msra.mxu3 %v177_v10  ;;  %261 = vmatpush.msra.mxu2 %v109_v15  ;;  %v104_v21 = vld [vmem:[#allocation5 + $0x140] sm:$0xff]  ;;  %v190_v8 = vld [vmem:[#allocation5 + $0x3f0] sm:$0xff] }
  0x1a   :  { %v105_v19 = vld [vmem:[#allocation5 + $0x148] sm:$0xff]  ;;  %v172_v22 = vld [vmem:[#allocation5 + $0x360] sm:$0xff]  ;;  %221 = vmatpush.msra.mxu0 %v108_v17  ;;  %240 = vmatpush.msra.mxu1 %v176_v18  ;;  %v60_v9 = vld [vmem:[#allocation2] sm:$0xf] }
  0x1b   :  { %v169_v20 = vld [vmem:[#allocation5 + $0x348] sm:$0xff]  ;;  %281 = vmatpush.msra.mxu3 %v173_v16  ;;  %262 = vmatpush.msra.mxu2 %v105_v19  ;;  %v100_v25 = vld [vmem:[#allocation5 + $0x120] sm:$0xff]  ;;  %v61_v10 = vld [vmem:[#allocation2 + $0x4] sm:$0xf]  ;;  %206 = vst [vmem:[#allocation1] ss:$4 sm:$0xff] %v60_v9 }
  0x1c   :  { %v101_v23 = vld [vmem:[#allocation5 + $0x128] sm:$0xff]  ;;  %v168_v26 = vld [vmem:[#allocation5 + $0x340] sm:$0xff]  ;;  %222 = vmatpush.msra.mxu0 %v104_v21  ;;  %241 = vmatpush.msra.mxu1 %v172_v22  ;;  %v62_v11 = vld [vmem:[#allocation2 + $0x8] sm:$0xf]  ;;  %208 = vst [vmem:[#allocation1 + $0x1] ss:$4 sm:$0xff] %v61_v10 }
  0x1d   :  { %v165_v24 = vld [vmem:[#allocation5 + $0x328] sm:$0xff]  ;;  %282 = vmatpush.msra.mxu3 %v169_v20  ;;  %263 = vmatpush.msra.mxu2 %v101_v23  ;;  %v96_v29 = vld [vmem:[#allocation5 + $0x100] sm:$0xff]  ;;  %v63_v12 = vld [vmem:[#allocation2 + $0xc] sm:$0xf]  ;;  %210 = vst [vmem:[#allocation1 + $0x2] ss:$4 sm:$0xff] %v62_v11 }
  0x1e   :  { %v97_v27 = vld [vmem:[#allocation5 + $0x108] sm:$0xff]  ;;  %v164_v30 = vld [vmem:[#allocation5 + $0x320] sm:$0xff]  ;;  %223 = vmatpush.msra.mxu0 %v100_v25  ;;  %242 = vmatpush.msra.mxu1 %v168_v26  ;;  %v115_v13 = vld [vmem:[#allocation5 + $0x198] sm:$0xff]  ;;  %212 = vst [vmem:[#allocation1 + $0x3] ss:$4 sm:$0xff] %v63_v12 }
  0x1f   :  { %v161_v28 = vld [vmem:[#allocation5 + $0x308] sm:$0xff]  ;;  %283 = vmatpush.msra.mxu3 %v165_v24  ;;  %264 = vmatpush.msra.mxu2 %v97_v27  ;;  %v92_v33 = vld [vmem:[#allocation5 + $0xe0] sm:$0xff]  ;;  %v179_v14 = vld [vmem:[#allocation5 + $0x398] sm:$0xff] }
  0x20   :  { %v93_v31 = vld [vmem:[#allocation5 + $0xe8] sm:$0xff]  ;;  %v160_v34 = vld [vmem:[#allocation5 + $0x300] sm:$0xff]  ;;  %224 = vmatpush.msra.mxu0 %v96_v29  ;;  %243 = vmatpush.msra.mxu1 %v164_v30  ;;  %v118_v15 = vld [vmem:[#allocation5 + $0x1b0] sm:$0xff] }
  0x21   :  { %v157_v32 = vld [vmem:[#allocation5 + $0x2e8] sm:$0xff]  ;;  %284 = vmatpush.msra.mxu3 %v161_v28  ;;  %265 = vmatpush.msra.mxu2 %v93_v31  ;;  %v88_v37 = vld [vmem:[#allocation5 + $0xc0] sm:$0xff]  ;;  %v186_v16 = vld [vmem:[#allocation5 + $0x3d0] sm:$0xff] }
  0x22   :  { %v89_v35 = vld [vmem:[#allocation5 + $0xc8] sm:$0xff]  ;;  %v156_v38 = vld [vmem:[#allocation5 + $0x2e0] sm:$0xff]  ;;  %225 = vmatpush.msra.mxu0 %v92_v33  ;;  %244 = vmatpush.msra.mxu1 %v160_v34  ;;  %v111_v17 = vld [vmem:[#allocation5 + $0x178] sm:$0xff] }
  0x23   :  { %v153_v36 = vld [vmem:[#allocation5 + $0x2c8] sm:$0xff]  ;;  %285 = vmatpush.msra.mxu3 %v157_v32  ;;  %266 = vmatpush.msra.mxu2 %v89_v35  ;;  %v84_v41 = vld [vmem:[#allocation5 + $0xa0] sm:$0xff]  ;;  %v175_v18 = vld [vmem:[#allocation5 + $0x378] sm:$0xff] }
  0x24   :  { %v85_v39 = vld [vmem:[#allocation5 + $0xa8] sm:$0xff]  ;;  %v152_v42 = vld [vmem:[#allocation5 + $0x2c0] sm:$0xff]  ;;  %226 = vmatpush.msra.mxu0 %v88_v37  ;;  %245 = vmatpush.msra.mxu1 %v156_v38  ;;  %v114_v19 = vld [vmem:[#allocation5 + $0x190] sm:$0xff] }
  0x25   :  { %v149_v40 = vld [vmem:[#allocation5 + $0x2a8] sm:$0xff]  ;;  %286 = vmatpush.msra.mxu3 %v153_v36  ;;  %267 = vmatpush.msra.mxu2 %v85_v39  ;;  %v80_v45 = vld [vmem:[#allocation5 + $0x80] sm:$0xff]  ;;  %v182_v20 = vld [vmem:[#allocation5 + $0x3b0] sm:$0xff] }
  0x26   :  { %v81_v43 = vld [vmem:[#allocation5 + $0x88] sm:$0xff]  ;;  %v148_v46 = vld [vmem:[#allocation5 + $0x2a0] sm:$0xff]  ;;  %227 = vmatpush.msra.mxu0 %v84_v41  ;;  %246 = vmatpush.msra.mxu1 %v152_v42  ;;  %v107_v21 = vld [vmem:[#allocation5 + $0x158] sm:$0xff] }
  0x27   :  { %v145_v44 = vld [vmem:[#allocation5 + $0x288] sm:$0xff]  ;;  %287 = vmatpush.msra.mxu3 %v149_v40  ;;  %268 = vmatpush.msra.mxu2 %v81_v43  ;;  %v76_v49 = vld [vmem:[#allocation5 + $0x60] sm:$0xff]  ;;  %v171_v22 = vld [vmem:[#allocation5 + $0x358] sm:$0xff] }
  0x28   :  { %v77_v47 = vld [vmem:[#allocation5 + $0x68] sm:$0xff]  ;;  %v144_v50 = vld [vmem:[#allocation5 + $0x280] sm:$0xff]  ;;  %228 = vmatpush.msra.mxu0 %v80_v45  ;;  %247 = vmatpush.msra.mxu1 %v148_v46  ;;  %v110_v23 = vld [vmem:[#allocation5 + $0x170] sm:$0xff] }
  0x29   :  { %v141_v48 = vld [vmem:[#allocation5 + $0x268] sm:$0xff]  ;;  %288 = vmatpush.msra.mxu3 %v145_v44  ;;  %269 = vmatpush.msra.mxu2 %v77_v47  ;;  %v72_v53 = vld [vmem:[#allocation5 + $0x40] sm:$0xff]  ;;  %v178_v24 = vld [vmem:[#allocation5 + $0x390] sm:$0xff] }
  0x2a   :  { %v73_v51 = vld [vmem:[#allocation5 + $0x48] sm:$0xff]  ;;  %v140_v54 = vld [vmem:[#allocation5 + $0x260] sm:$0xff]  ;;  %229 = vmatpush.msra.mxu0 %v76_v49  ;;  %248 = vmatpush.msra.mxu1 %v144_v50  ;;  %v103_v25 = vld [vmem:[#allocation5 + $0x138] sm:$0xff] }
  0x2b   :  { %v137_v52 = vld [vmem:[#allocation5 + $0x248] sm:$0xff]  ;;  %289 = vmatpush.msra.mxu3 %v141_v48  ;;  %270 = vmatpush.msra.mxu2 %v73_v51  ;;  %v68_v57 = vld [vmem:[#allocation5 + $0x20] sm:$0xff]  ;;  %v167_v26 = vld [vmem:[#allocation5 + $0x338] sm:$0xff] }
  0x2c   :  { %v69_v55 = vld [vmem:[#allocation5 + $0x28] sm:$0xff]  ;;  %v136_v58 = vld [vmem:[#allocation5 + $0x240] sm:$0xff]  ;;  %230 = vmatpush.msra.mxu0 %v72_v53  ;;  %249 = vmatpush.msra.mxu1 %v140_v54  ;;  %v106_v27 = vld [vmem:[#allocation5 + $0x150] sm:$0xff] }
  0x2d   :  { %v133_v56 = vld [vmem:[#allocation5 + $0x228] sm:$0xff]  ;;  %290 = vmatpush.msra.mxu3 %v137_v52  ;;  %271 = vmatpush.msra.mxu2 %v69_v55  ;;  %v64_v0 = vld [vmem:[#allocation5] sm:$0xff]  ;;  %v174_v28 = vld [vmem:[#allocation5 + $0x370] sm:$0xff] }
  0x2e   :  { %v65_v59 = vld [vmem:[#allocation5 + $0x8] sm:$0xff]  ;;  %231 = vmatpush.msra.mxu0 %v68_v57  ;;  %250 = vmatpush.msra.mxu1 %v136_v58  ;;  %v132_v1 = vld [vmem:[#allocation5 + $0x220] sm:$0xff]  ;;  %v99_v29 = vld [vmem:[#allocation5 + $0x118] sm:$0xff] }
  0x2f   :  { %v129_v60 = vld [vmem:[#allocation5 + $0x208] sm:$0xff]  ;;  %291 = vmatpush.msra.mxu3 %v133_v56  ;;  %272 = vmatpush.msra.mxu2 %v65_v59  ;;  %v128_v6 = vld [vmem:[#allocation5 + $0x200] sm:$0xff]  ;;  %v163_v30 = vld [vmem:[#allocation5 + $0x318] sm:$0xff] }
  0x30   :  { %232 = vmatpush.msra.mxu0 %v64_v0  ;;  %251 = vmatpush.msra.mxu1 %v132_v1  ;;  %v102_v31 = vld [vmem:[#allocation5 + $0x130] sm:$0xff]  ;;  %v95_v33 = vld [vmem:[#allocation5 + $0xf8] sm:$0xff]  ;;  %v584_v39 = vld.sshfl [vmem:[#allocation1] sm:$0xff pattern:$0x73625140] }
  0x31   :  { %292 = vmatpush.msra.mxu3 %v129_v60  ;;  %337 = vmatpush.msrb.mxu2 %v127_v61  ;;  %v170_v32 = vld [vmem:[#allocation5 + $0x350] sm:$0xff]  ;;  %v159_v34 = vld [vmem:[#allocation5 + $0x2f8] sm:$0xff] }
  0x32   :  { %297 = vmatpush.msrb.mxu0 %v126_v4  ;;  %252 = vmatpush.msra.mxu1 %v128_v6  ;;  %v98_v35 = vld [vmem:[#allocation5 + $0x110] sm:$0xff]  ;;  %v91_v37 = vld [vmem:[#allocation5 + $0xd8] sm:$0xff]  ;;  %v192_v6 = vld [vmem:[#allocation7] sm:$0xf] }
  0x33   :  { %357 = vmatpush.msrb.mxu3 %v191_v62  ;;  %338 = vmatpush.msrb.mxu2 %v123_v63  ;;  %v166_v36 = vld [vmem:[#allocation5 + $0x330] sm:$0xff]  ;;  %v155_v38 = vld [vmem:[#allocation5 + $0x2d8] sm:$0xff]  ;;  %v194_v12 = vperm.slane %v192_v6, 0 }
  0x34   :  { %298 = vmatpush.msrb.mxu0 %v122_v7  ;;  %317 = vmatpush.msrb.mxu1 %v190_v8  ;;  %v94_v40 = vld [vmem:[#allocation5 + $0xf0] sm:$0xff]  ;;  %v87_v41 = vld [vmem:[#allocation5 + $0xb8] sm:$0xff]  ;;  %v195_v7 = vperm.slane %v192_v6, 1 }
  0x35   :  { %358 = vmatpush.msrb.mxu3 %v187_v3  ;;  %339 = vmatpush.msrb.mxu2 %v119_v2  ;;  %v162_v42 = vld [vmem:[#allocation5 + $0x310] sm:$0xff]  ;;  %v151_v43 = vld [vmem:[#allocation5 + $0x2b8] sm:$0xff] }
  0x36   :  { %299 = vmatpush.msrb.mxu0 %v118_v15  ;;  %318 = vmatpush.msrb.mxu1 %v186_v16  ;;  %v90_v44 = vld [vmem:[#allocation5 + $0xd0] sm:$0xff]  ;;  %v83_v45 = vld [vmem:[#allocation5 + $0x98] sm:$0xff]  ;;  %v197_v15 = vperm.slane %v192_v6, 3 }
  0x37   :  { %359 = vmatpush.msrb.mxu3 %v183_v5  ;;  %340 = vmatpush.msrb.mxu2 %v115_v13  ;;  %v214_v46 = vld.sshfl [vmem:[#allocation1 + $0x8] sm:$0xff pattern:$0x73625140]  ;;  %v147_v48 = vld [vmem:[#allocation5 + $0x298] sm:$0xff] }
  0x38   :  { %300 = vmatpush.msrb.mxu0 %v114_v19  ;;  %319 = vmatpush.msrb.mxu1 %v182_v20  ;;  %v158_v47 = vld [vmem:[#allocation5 + $0x2f0] sm:$0xff]  ;;  %v79_v49 = vld [vmem:[#allocation5 + $0x78] sm:$0xff] }
  0x39   :  { %360 = vmatpush.msrb.mxu3 %v179_v14  ;;  %341 = vmatpush.msrb.mxu2 %v111_v17  ;;  %v86_v50 = vld [vmem:[#allocation5 + $0xb0] sm:$0xff]  ;;  %v143_v52 = vld [vmem:[#allocation5 + $0x278] sm:$0xff]  ;;  %v196_v14 = vperm.slane %v192_v6, 2 }
  0x3a   :  { %301 = vmatpush.msrb.mxu0 %v110_v23  ;;  %320 = vmatpush.msrb.mxu1 %v178_v24  ;;  %v154_v51 = vld [vmem:[#allocation5 + $0x2d0] sm:$0xff]  ;;  %v75_v53 = vld [vmem:[#allocation5 + $0x58] sm:$0xff] }
  0x3b   :  { %361 = vmatpush.msrb.mxu3 %v175_v18  ;;  %342 = vmatpush.msrb.mxu2 %v107_v21  ;;  %v82_v54 = vld [vmem:[#allocation5 + $0x90] sm:$0xff]  ;;  %v139_v56 = vld [vmem:[#allocation5 + $0x258] sm:$0xff] }
  0x3c   :  { %302 = vmatpush.msrb.mxu0 %v106_v27  ;;  %321 = vmatpush.msrb.mxu1 %v174_v28  ;;  %v150_v55 = vld [vmem:[#allocation5 + $0x2b0] sm:$0xff]  ;;  %v71_v57 = vld [vmem:[#allocation5 + $0x38] sm:$0xff] }
  0x3d   :  { %362 = vmatpush.msrb.mxu3 %v171_v22  ;;  %343 = vmatpush.msrb.mxu2 %v103_v25  ;;  %v78_v58 = vld [vmem:[#allocation5 + $0x70] sm:$0xff]  ;;  %v67_v60 = vld [vmem:[#allocation5 + $0x18] sm:$0xff] }
  0x3e   :  { %303 = vmatpush.msrb.mxu0 %v102_v31  ;;  %322 = vmatpush.msrb.mxu1 %v170_v32  ;;  %v146_v59 = vld [vmem:[#allocation5 + $0x290] sm:$0xff]  ;;  %v135_v61 = vld [vmem:[#allocation5 + $0x238] sm:$0xff] }
  0x3f   :  { %363 = vmatpush.msrb.mxu3 %v167_v26  ;;  %344 = vmatpush.msrb.mxu2 %v99_v29  ;;  %v74_v62 = vld [vmem:[#allocation5 + $0x50] sm:$0xff]  ;;  %v131_v0 = vld [vmem:[#allocation5 + $0x218] sm:$0xff] }
  0x40   :  { %304 = vmatpush.msrb.mxu0 %v98_v35  ;;  %323 = vmatpush.msrb.mxu1 %v166_v36  ;;  %v142_v63 = vld [vmem:[#allocation5 + $0x270] sm:$0xff] }
  0x41   :  { %364 = vmatpush.msrb.mxu3 %v163_v30  ;;  %345 = vmatpush.msrb.mxu2 %v95_v33  ;;  %v70_v1 = vld [vmem:[#allocation5 + $0x30] sm:$0xff] }
  0x42   :  { %273 = vmatmul.f32.vlgmr.msra.gmra.mxu2 %v584_v39  ;;  %305 = vmatpush.msrb.mxu0 %v94_v40  ;;  %v138_v2 = vld [vmem:[#allocation5 + $0x250] sm:$0xff] }
  0x43   :  { %365 = vmatpush.msrb.mxu3 %v159_v34  ;;  %346 = vmatpush.msrb.mxu2 %v91_v37  ;;  %v66_v3 = vld [vmem:[#allocation5 + $0x10] sm:$0xff] }
  0x44   :  { %324 = vmatpush.msrb.mxu1 %v162_v42  ;;  %306 = vmatpush.msrb.mxu0 %v90_v44  ;;  %v134_v4 = vld [vmem:[#allocation5 + $0x230] sm:$0xff] }
  0x45   :  { %366 = vmatpush.msrb.mxu3 %v155_v38  ;;  %347 = vmatpush.msrb.mxu2 %v87_v41  ;;  %v130_v5 = vld [vmem:[#allocation5 + $0x210] sm:$0xff] }
  0x46   :  { %293 = vmatmul.f32.vlgmr.msra.gmra.mxu3 %v214_v46  ;;  %325 = vmatpush.msrb.mxu1 %v158_v47 }
  0x47   :  { %367 = vmatpush.msrb.mxu3 %v151_v43  ;;  %348 = vmatpush.msrb.mxu2 %v83_v45 }
  0x48   :  { %307 = vmatpush.msrb.mxu0 %v86_v50  ;;  %326 = vmatpush.msrb.mxu1 %v154_v51 }
  0x49   :  { %368 = vmatpush.msrb.mxu3 %v147_v48  ;;  %349 = vmatpush.msrb.mxu2 %v79_v49 }
  0x4a   :  { %308 = vmatpush.msrb.mxu0 %v82_v54  ;;  %327 = vmatpush.msrb.mxu1 %v150_v55 }
  0x4b   :  { %369 = vmatpush.msrb.mxu3 %v143_v52  ;;  %350 = vmatpush.msrb.mxu2 %v75_v53 }
  0x4c   :  { %233 = vmatmul.f32.vlgmr.msra.gmra.mxu0 %v584_v39  ;;  %328 = vmatpush.msrb.mxu1 %v146_v59 }
  0x4d   :  { %370 = vmatpush.msrb.mxu3 %v139_v56  ;;  %351 = vmatpush.msrb.mxu2 %v71_v57 }
  0x4e   :  { %309 = vmatpush.msrb.mxu0 %v78_v58  ;;  %253 = vmatmul.f32.vlgmr.msra.gmra.mxu1 %v214_v46 }
  0x4f   :  { %352 = vmatpush.msrb.mxu2 %v67_v60  ;;  %371 = vmatpush.msrb.mxu3 %v135_v61 }
  0x50   :  { %353 = vmatmul.f32.vlgmr.msrb.gmra.mxu2 %v584_v39  ;;  %310 = vmatpush.msrb.mxu0 %v74_v62 }
  0x51   :  { %329 = vmatpush.msrb.mxu1 %v142_v63  ;;  %372 = vmatpush.msrb.mxu3 %v131_v0 }
  0x52   :  { %373 = vmatmul.f32.vlgmr.msrb.gmra.mxu3 %v214_v46  ;;  %311 = vmatpush.msrb.mxu0 %v70_v1 }
  0x53   :  { %330 = vmatpush.msrb.mxu1 %v138_v2 }
  0x54   :  { %312 = vmatpush.msrb.mxu0 %v66_v3 }
  0x55   :  { %331 = vmatpush.msrb.mxu1 %v134_v4  ;;  %313 = vmatmul.f32.vlgmr.msrb.gmra.mxu0 %v584_v39 }
  0x57   :  { %332 = vmatpush.msrb.mxu1 %v130_v5 }
  0x58   :  { %333 = vmatmul.f32.vlgmr.msrb.gmra.mxu1 %v214_v46 }
  0xc5   :  { %v274_v9 = vpop.f32.mrf.mxu2 }
  0xc6   :  { %v275_v11 = vadd.f32 %v274_v9, %v195_v7 }
  0xc9   :  { %v234_v8 = vpop.f32.mrf.mxu0  ;;  %v294_v13 = vpop.f32.mrf.mxu3 }
  0xca   :  { %v235_v16 = vadd.f32 %v234_v8, %v194_v12  ;;  %v295_v17 = vadd.f32 %v294_v13, %v275_v11 }
  0xcb   :  { %v254_v10 = vpop.f32.mrf.mxu1 }
  0xcc   :  { %v381_v22 = vrot.slane %v295_v17, 6  ;;  %v255_v23 = vadd.f32 %v254_v10, %v235_v16 }
  0xce   :  { %v385_v30 = vsel %vm384_vm0, %v255_v23, %v381_v22  ;;  %v391_v31 = vsel %vm390_vm2, %v255_v23, %v381_v22  ;;  %v397_v32 = vsel %vm386_vm1, %v255_v23, %v381_v22  ;;  %v401_v33 = vsel %vm392_vm3, %v381_v22, %v255_v23 }
  0xd2   :  { %v314_v18 = vpop.f32.mrf.mxu0 }
  0xd3   :  { %v354_v19 = vpop.f32.mrf.mxu2  ;;  %v315_v20 = vadd.f32 %v314_v18, %v196_v14 }
  0xd4   :  { %v355_v21 = vadd.f32 %v354_v19, %v197_v15 }
  0xd5   :  { %v334_v24 = vpop.f32.mrf.mxu1  ;;  %v374_v25 = vpop.f32.mrf.mxu3 }
  0xd6   :  { %v335_v26 = vadd.f32 %v334_v24, %v315_v20  ;;  %v375_v27 = vadd.f32 %v374_v25, %v355_v21 }
  0xd8   :  { %v382_v28 = vrot.slane %v335_v26, 4  ;;  %v383_v29 = vrot.slane %v375_v27, 2 }
  0xda   :  { %v387_v34 = vsel %vm386_vm1, %v382_v28, %v383_v29  ;;  %v393_v35 = vsel %vm392_vm3, %v383_v29, %v382_v28  ;;  %v398_v36 = vsel %vm384_vm0, %v382_v28, %v383_v29  ;;  %v402_v37 = vsel %vm390_vm2, %v382_v28, %v383_v29 }
  0xdb   :  { %v389_v38 = vsel %vm388_vm4, %v385_v30, %v387_v34  ;;  %v395_v39 = vsel %vm394_vm5, %v391_v31, %v393_v35  ;;  %v399_v40 = vsel %vm388_vm4, %v398_v36, %v397_v32  ;;  %v403_v41 = vsel %vm394_vm5, %v402_v37, %v401_v33 }
  0xdc   :  { %v396_v42 = vrot.slane %v395_v39, 2  ;;  %v400_v43 = vrot.slane %v399_v40, 4  ;;  %v404_v44 = vrot.slane %v403_v41, 6  ;;  %409 = vst [vmem:[#allocation8] sm:$0xff] %v389_v38 }
  0xde   :  { %410 = vst [vmem:[#allocation8 + $0x8] sm:$0xff] %v396_v42 }
  0xdf   :  { %411 = vst [vmem:[#allocation8 + $0x10] sm:$0xff] %v400_v43 }
  0xe0   :  { %412 = vst [vmem:[#allocation8 + $0x18] sm:$0xff] %v404_v44 }
  0xe1   :  { %416 = vsyncadd [#allocation4], 384  ;;  %s419_s30 = sshll.u32 %s598_s3, 4  ;;  %s552_s4 = smov [#allocation8]   ;;  %s420_s30 = int_to_ptr.hbm [resolvable:$true] %s419_s30 }
  0xe2   :  { %s417_s5 = sshll.u32 %s552_s4, 4  ;;  %s553_s6 = smov 128   ;;  %s418_s5 = int_to_ptr.vmem [resolvable:$true] %s417_s5 }
  0xe3   :  { %s554_s7 = smov 8  }
  0xe4   :  { %425 = dma.vmem_to_hbm [thread:$0]  %s418_s5, 128, %s420_s30, [#allocation4], %s553_s6, %s553_s6, %s554_s7  }
  0xe5   :  { %543 = dma.done.wait [#allocation4], 512  }
  0xe6   :  { %544 = vsyncadd [#allocation4], 4294966784 }
  0xe7   :  { %430 = vsyncpa [#allocation3], 1 }
  0xe8   :  { %431 = vsyncpa [#allocation6], 1 }
  0xe9   :  { %432 = vsyncpa [#allocation4], 1 }

</bundles_post_ra>
